<compile_context>
chip_gen: v7x
topology: tpu7x:2x2x1
jax: 0.10.0
libtpu: 0.0.40
codegen_flags: <defaults>
</compile_context>

<pallas_src>
import functools

import jax
import jax.numpy as jnp
from jax import lax
from jax.experimental import pallas as pl
from jax.experimental.pallas import tpu as pltpu


_LANE = 128
_ROW_QUANTUM = 1024                      # 8 sublanes * 128 lanes -> clean (8,128) slabs
_MAX_TK = 2048                           # feature lanes per D tile (8 KiB f32 per row)
_GROUP_TEMP_BYTES = 2 * 1024 * 1024      # bound on the per-group x*w temporary


def _cdiv(a, b):
    return -(-a // b)


def _round_up(x, m):
    return _cdiv(x, m) * m


def _logreg_kernel(x_ref, w_ref, o_ref, acc_ref, *, d_total, n_groups):
    # x_ref:   (tb, tk)        batch tile x feature tile of x
    # w_ref:   (1, tk)         matching feature tile of W (tiny, re-fetched per k)
    # o_ref:   (tb//128, 128)  lane-dense output slab block (written at k == last)
    # acc_ref: (tb//128, 128)  f32 accumulator, resident across the D ("k") axis
    k = pl.program_id(1)
    tb, tk = x_ref.shape
    tr, lane = acc_ref.shape

    @pl.when(k == 0)
    def _():
        acc_ref[...] = jnp.zeros_like(acc_ref)

    w = w_ref[...].reshape(1, 1, tk)

    # Ragged last D tile: out-of-bounds lanes of BOTH x and w are garbage
    # (possibly NaN), so mask the *product* (select discards NaN operands).
    ragged_d = (d_total % tk) != 0
    if ragged_d:
        lane_ids = lax.broadcasted_iota(jnp.int32, (1, 1, tk), 2)
        lane_valid = (k * tk + lane_ids) < d_total

    def partial_dot(x_rows):
        # (rows, tk) -> (rows//128, 128) per-row dot with w.
        # VPU multiply + XLU lane reduction; MXU stays idle (HBM-bound kernel).
        rows = x_rows.shape[0]
        prod = x_rows.reshape(rows // lane, lane, tk) * w
        if ragged_d:
            prod = jnp.where(lane_valid, prod, 0.0)
        return jnp.sum(prod, axis=-1)

    if n_groups == 1:
        acc_ref[...] += partial_dot(x_ref[...])
    else:
        # Row groups bound the x*w temporary to ~tile/n_groups bytes instead of
        # a full-tile temporary, which is what lets the tile grow to 12-16 MiB
        # inside v7x's 64 MiB VMEM.
        rows_per_group = tb // n_groups          # multiple of 1024 by construction
        pages_per_group = rows_per_group // lane  # multiple of 8

        def group(g, carry):
            r0 = pl.multiple_of(g * rows_per_group, rows_per_group)
            p0 = pl.multiple_of(g * pages_per_group, pages_per_group)
            acc_ref[pl.ds(p0, pages_per_group), :] += partial_dot(
                x_ref[pl.ds(r0, rows_per_group), :])
            return carry

        lax.fori_loop(0, n_groups, group, 0, unroll=True)

    @pl.when(k == pl.num_programs(1) - 1)
    def _():
        o_ref[...] = jax.nn.sigmoid(acc_ref[...]).astype(o_ref.dtype)


def logistic_regression_forward(x, w, *, x_tile_bytes=None):
    """sigmoid(x @ w.T) for x: (B, D), w: (1, D) (nn.Linear layout). Returns (B, 1)."""
    B, D = x.shape
    assert w.shape == (1, D), w.shape
    itemsize = x.dtype.itemsize

    # ---- VMEM budget (chip dependent) ---------------------------------------
    try:
        vmem_cap = int(pltpu.get_tpu_info().vmem_capacity_bytes)
    except Exception:
        vmem_cap = 64 * 1024 * 1024               # conservative (v7x per-TC VMEM)
    vmem_limit = min(64 * 1024 * 1024, (vmem_cap * 3) // 4)   # v7x ~48 MiB, v5e/v6e 64 MiB
    # Per step: 2 double-buffered x tiles + bounded temporaries; leave headroom.
    tile_cap = max(2 * 1024 * 1024, (vmem_limit - 12 * 1024 * 1024) // 3)
    if x_tile_bytes is None:
        x_tile_bytes = min(16 * 1024 * 1024, tile_cap)
    x_tile_bytes = min(x_tile_bytes, tile_cap)

    # ---- feature (D) tiling --------------------------------------------------
    if D <= _MAX_TK:
        tk, num_k = D, 1                          # single full-extent feature block
    else:
        tk, num_k = _MAX_TK, _cdiv(D, _MAX_TK)    # ragged tail masked in-kernel

    # ---- batch tiling --------------------------------------------------------
    row_bytes = tk * itemsize
    rows_budget = max(_ROW_QUANTUM, x_tile_bytes // row_bytes)
    # Granularity keeps (8,128)-aligned slab blocks and lets the tile split into
    # up to 8 whole-1024-row groups.
    gran = 8 * _ROW_QUANTUM if rows_budget >= 8 * _ROW_QUANTUM else _ROW_QUANTUM
    rows_budget = max(_ROW_QUANTUM, (rows_budget // gran) * gran)

    b_min = _round_up(B, _LANE)
    if b_min <= rows_budget:
        tb, num_tiles = b_min, 1                  # single tile (tiny / moderate B)
    else:
        tb = rows_budget
        num_tiles = _cdiv(B, tb)
        # v7x megacore: batch axis is "parallel" -> prefer an even tile count.
        if num_tiles % 2 == 1:
            cand = _round_up(_cdiv(B, num_tiles + 1), _ROW_QUANTUM)
            if _cdiv(B, cand) % 2 == 0:
                tb, num_tiles = cand, _cdiv(B, cand)

    # ---- in-tile row grouping (bounds the x*w product temporary) -------------
    tile_bytes = tb * row_bytes
    n_groups = 1
    while (n_groups < 8
           and tile_bytes // n_groups > _GROUP_TEMP_BYTES
           and tb % (2 * n_groups * _ROW_QUANTUM) == 0):
        n_groups *= 2

    tr = tb // _LANE
    b_pad = num_tiles * tb

    kernel = functools.partial(_logreg_kernel, d_total=D, n_groups=n_groups)

    out_slab = pl.pallas_call(
        kernel,
        out_shape=jax.ShapeDtypeStruct((b_pad // _LANE, _LANE), x.dtype),
        grid=(num_tiles, num_k),
        in_specs=[
            pl.BlockSpec((tb, tk), lambda i, k: (i, k)),    # x tile (double-buffered DMA)
            pl.BlockSpec((1, tk), lambda i, k: (0, k)),     # w feature tile (tiny)
        ],
        out_specs=pl.BlockSpec((tr, _LANE), lambda i, k: (i, 0)),   # lane-dense slab
        scratch_shapes=[pltpu.VMEM((tr, _LANE), jnp.float32)],      # f32 accumulator
        compiler_params=pltpu.CompilerParams(
            dimension_semantics=("parallel", "arbitrary"),
            vmem_limit_bytes=int(vmem_limit),
        ),
        cost_estimate=pl.CostEstimate(
            flops=2 * B * D,
            transcendentals=B,
            bytes_accessed=itemsize * (B * D + D + B),
        ),
    )(x, w)

    # Layout plumbing only: slab -> (B, 1). Positions >= B came from the
    # garbage-padded batch tail and are sliced away (never reuse them).
    return out_slab.reshape(-1, 1)[:B]


if __name__ == "__main__":
    key = jax.random.PRNGKey(0)

    def make_case(k, batch, input_dim):
        kx, kw = jax.random.split(k)
        x = jax.random.normal(kx, (batch, input_dim), dtype=jnp.float32)
        bound = 1.0 / float(input_dim) ** 0.5    # mimic nn.Linear uniform init
        w = jax.random.uniform(kw, (1, input_dim), dtype=jnp.float32,
                               minval=-bound, maxval=bound)
        return x, w

    # Cases exercise every code path:
    #   1. tiny single 128-row tile (full-extent blocks)
    #   2. single tile with a ragged batch tail
    #   3. forced-small tiles -> multi-tile grid + even-tile-count adjustment
    #   4. in-tile row-group loop (n_groups > 1)
    #   5. D tiling (num_k > 1) with a ragged, masked last feature tile
    cases = [
        dict(batch=8,     input_dim=32),
        dict(batch=2500,  input_dim=64),
        dict(batch=10000, input_dim=64, x_tile_bytes=1 << 20),
        dict(batch=2048,  input_dim=640),
        dict(batch=1024,  input_dim=2200),
    ]
    keys = jax.random.split(key, len(cases))
    for k, cfg in zip(keys, cases):
        x, w = make_case(k, cfg["batch"], cfg["input_dim"])
        y = logistic_regression_forward(x, w, x_tile_bytes=cfg.get("x_tile_bytes"))
        jax.block_until_ready(y)
        y_ref = jax.nn.sigmoid(jnp.sum(x * w, axis=-1, keepdims=True))
        assert y.shape == (cfg["batch"], 1), y.shape
        err = float(jnp.max(jnp.abs(y - y_ref)))
        assert err < 1e-5, err

    print("KERNEL_OK")
</pallas_src>

<mosaic_0001>
module attributes {stable_mosaic.version = 11 : i64} {
  func.func @_logreg_kernel(%arg0: i32, %arg1: i32, %arg2: memref<128x32xf32, #tpu.memory_space<vmem>>, %arg3: memref<1x32xf32, #tpu.memory_space<vmem>>, %arg4: memref<1x128xf32, #tpu.memory_space<vmem>>, %arg5: memref<1x128xf32, #tpu.memory_space<vmem>>) attributes {dimension_semantics = [#tpu.dimension_semantics<parallel>, #tpu.dimension_semantics<arbitrary>], iteration_bounds = array<i64: 1, 1>, scalar_prefetch = 0 : i64, scratch_operands = 1 : i64, tpu.core_type = #tpu.core_type<tc>, window_params = [{transform_indices = @transform_0, window_bounds = array<i64: 128, 32>}, {transform_indices = @transform_1, window_bounds = array<i64: 1, 32>}, {transform_indices = @transform_2, window_bounds = array<i64: 1, 128>}]} {
    %c0_i32 = arith.constant 0 : i32
    %0 = arith.cmpi eq, %arg1, %c0_i32 : i32
    %1 = arith.extui %0 : i1 to i32
    %c0_i32_0 = arith.constant 0 : i32
    %2 = arith.cmpi ne, %1, %c0_i32_0 : i32
    scf.if %2 {
      %cst_10 = arith.constant 0.000000e+00 : f32
      %16 = vector.broadcast %cst_10 : f32 to vector<1x128xf32>
      %c0_11 = arith.constant 0 : index
      %c0_12 = arith.constant 0 : index
      %17 = vector.load %arg5[%c0_11, %c0_12] : memref<1x128xf32, #tpu.memory_space<vmem>>, vector<1x128xf32>
      tpu.vector_store %arg5[%c0_11, %c0_12], %16 {strides = array<i32>} : memref<1x128xf32, #tpu.memory_space<vmem>>, vector<1x128xf32>,
    } else {
    }
    %c0 = arith.constant 0 : index
    %c0_1 = arith.constant 0 : index
    %3 = vector.load %arg3[%c0, %c0_1] : memref<1x32xf32, #tpu.memory_space<vmem>>, vector<1x32xf32>
    %4 = vector.shape_cast %3 : vector<1x32xf32> to vector<1x1x32xf32>
    %c0_2 = arith.constant 0 : index
    %c0_3 = arith.constant 0 : index
    %5 = vector.load %arg5[%c0_2, %c0_3] : memref<1x128xf32, #tpu.memory_space<vmem>>, vector<1x128xf32>
    %c0_4 = arith.constant 0 : index
    %c0_5 = arith.constant 0 : index
    %6 = vector.load %arg2[%c0_4, %c0_5] : memref<128x32xf32, #tpu.memory_space<vmem>>, vector<128x32xf32>
    %7 = vector.shape_cast %6 : vector<128x32xf32> to vector<1x128x32xf32>
    %8 = vector.broadcast %4 : vector<1x1x32xf32> to vector<1x128x32xf32>
    %9 = arith.mulf %7, %8 : vector<1x128x32xf32>
    %cst = arith.constant dense<0.000000e+00> : vector<1x128xf32>
    %10 = vector.multi_reduction <add>, %9, %cst [2] : vector<1x128x32xf32> to vector<1x128xf32>
    %11 = arith.addf %5, %10 : vector<1x128xf32>
    %c0_6 = arith.constant 0 : index
    %c0_7 = arith.constant 0 : index
    %12 = vector.load %arg5[%c0_6, %c0_7] : memref<1x128xf32, #tpu.memory_space<vmem>>, vector<1x128xf32>
    tpu.vector_store %arg5[%c0_6, %c0_7], %11 {strides = array<i32>} : memref<1x128xf32, #tpu.memory_space<vmem>>, vector<1x128xf32>,
    %c0_i32_8 = arith.constant 0 : i32
    %13 = arith.cmpi eq, %arg1, %c0_i32_8 : i32
    %14 = arith.extui %13 : i1 to i32
    %c0_i32_9 = arith.constant 0 : i32
    %15 = arith.cmpi ne, %14, %c0_i32_9 : i32
    scf.if %15 {
      %c0_10 = arith.constant 0 : index
      %c0_11 = arith.constant 0 : index
      %16 = vector.load %arg5[%c0_10, %c0_11] : memref<1x128xf32, #tpu.memory_space<vmem>>, vector<1x128xf32>
      %17 = arith.negf %16 : vector<1x128xf32>
      %18 = math.exp %17 : vector<1x128xf32>
      %cst_12 = arith.constant 1.000000e+00 : f32
      %19 = vector.broadcast %cst_12 : f32 to vector<1x128xf32>
      %20 = arith.addf %19, %18 : vector<1x128xf32>
      %21 = arith.divf %19, %20 : vector<1x128xf32>
      %c0_13 = arith.constant 0 : index
      %c0_14 = arith.constant 0 : index
      %22 = vector.load %arg4[%c0_13, %c0_14] : memref<1x128xf32, #tpu.memory_space<vmem>>, vector<1x128xf32>
      tpu.vector_store %arg4[%c0_13, %c0_14], %21 {strides = array<i32>} : memref<1x128xf32, #tpu.memory_space<vmem>>, vector<1x128xf32>,
    } else {
    }
    return
  }
  func.func @transform_0(%arg0: i32, %arg1: i32) -> (i32, i32) {
    %c0_i32 = arith.constant 0 : i32
    return %arg0, %arg1 : i32, i32
  }
  func.func @transform_1(%arg0: i32, %arg1: i32) -> (i32, i32) {
    %c0_i32 = arith.constant 0 : i32
    %c0_i32_0 = arith.constant 0 : i32
    return %c0_i32, %arg1 : i32, i32
  }
  func.func @transform_2(%arg0: i32, %arg1: i32) -> (i32, i32) {
    %c0_i32 = arith.constant 0 : i32
    %c0_i32_0 = arith.constant 0 : i32
    return %arg0, %c0_i32 : i32, i32
  }
}

</mosaic_0001>

<bundles_post_ra>
// kernel: tpu_custom_call.1
= control target key start
LH: loop header
LB: loop body
LE: loop exit
PB: predicated region body
PF: predicated region fallthrough
CT: control target
= control target key end

     0   :  { %7 = vsyncpa [#allocation4], 0  ;;  %s2083_s0 = inlined_call_operand.hbm [shape: f32[8,32], index: 0, kind: input, shape index: {}]   ;;  %s2084_s1 = inlined_call_operand.vmem [shape: f32[1,32], index: 1, kind: input, shape index: {}]   ;;  %s2085_s2 = inlined_call_operand.hbm [shape: f32[1,128], index: 2, kind: output, shape index: {}]  }
   0x1   :  { %8 = vsyncpa [#allocation5], 0 }
   0x2   :  { %13 = vsyncadd [#allocation4], 1920  ;;  %s1697_s9 = smov [#allocation3]   ;;  %s1649_s13 = scalar_lea.hbm %s2083_s0, 128 }
   0x3   :  { %s14_s10 = sshll.u32 %s1697_s9, 4  ;;  %p1650_p0 = scmp.ne.s32.totalorder %s2083_s0, %s1649_s13  ;;  %s15_s10 = int_to_ptr.vmem [resolvable:$true] %s14_s10 }
   0x4   :  { %p1653_p1 = scmp.lt.u32.totalorder %s1649_s13, %s2083_s0 }
   0x6   :  { %p1655_p2 = pnand %p1653_p1, %p1650_p0 }
   0x8   :  { %1658 = shalt.err (!%p1655_p2)
}
   0x9   :  { %s1659_s18 = scalar_lea.vmem %s15_s10, 128  ;;  %s1663_s19 = scalar_lea.vmem %s15_s10, 2048 }
   0xa   :  { %p1660_p3 = scmp.ne.s32.totalorder %s15_s10, %s1659_s18  ;;  %p1664_p4 = scmp.lt.s32.totalorder %s15_s10, %s15_s10 }
   0xb   :  { %p1665_p5 = scmp.lt.s32.totalorder %s1663_s19, %s1659_s18 }
   0xd   :  { %p1666_p6 = por %p1665_p5, %p1664_p4 }
   0xf   :  { %p1667_p7 = pnand %p1666_p6, %p1660_p3 }
  0x11   :  { %1670 = shalt.err (!%p1667_p7)
}
  0x12   :  { %s1698_s20 = smov 128   ;;  %s1699_s21 = smov 8  }
  0x13   :  { %20 = dma.hbm_to_vmem [thread:$0]  %s2083_s0, 128, %s15_s10, [#allocation4], %s1698_s20, %s1698_s20, %s1699_s21  }
  0x14   :  { %1693 = dma.done.wait [#allocation4], 2048  }
  0x15   :  { %1694 = vsyncadd [#allocation4], 4294965248  ;;  %v1634_v0 = vld [vmem:[%s2084_s1] ss:$0 sm:$0xff]  ;;  %v33_v1 = vld [vmem:[#allocation3] sm:$0xff]  ;;  %vm71_vm0 = vcmask 261120   ;;  %v136_v50 = vlaneseq }
  0x16   :  { %v35_v2 = vld [vmem:[#allocation3 + $0x10] sm:$0xff]  ;;  %v55_v3 = vmul.f32 %v1634_v0, %v33_v1  ;;  %v34_v5 = vld [vmem:[#allocation3 + $0x8] sm:$0xff]  ;;  %v36_v6 = vld [vmem:[#allocation3 + $0x18] sm:$0xff]  ;;  %v1700_v47 = vmov 0   ;;  %v1701_v51 = vmov 1966171168  }
  0x17   :  { %v57_v4 = vmul.f32 %v1634_v0, %v35_v2  ;;  %v56_v7 = vmul.f32 %v1634_v0, %v34_v5  ;;  %v58_v8 = vmul.f32 %v1634_v0, %v36_v6  ;;  %v38_v9 = vld [vmem:[#allocation3 + $0x28] sm:$0xff]  ;;  %v37_v10 = vld [vmem:[#allocation3 + $0x20] sm:$0xff]  ;;  %v40_v17 = vld [vmem:[#allocation3 + $0x38] sm:$0xff]  ;;  %1643 = vset.pattern.permute.xlu0 %v1700_v47  ;;  %1644 = vset.pattern.permute.xlu1 %v1700_v47  ;;  %v653_v52 = vunpack.c.l.s4 %v1701_v51  ;;  %s1703_s0 = smov [#allocation6]  }
  0x18   :  { %v72_v11 = vsel %vm71_vm0, %v55_v3, 0.0  ;;  %v60_v15 = vmul.f32 %v1634_v0, %v38_v9  ;;  %v59_v16 = vmul.f32 %v1634_v0, %v37_v10  ;;  %v39_v18 = vld [vmem:[#allocation3 + $0x30] sm:$0xff]  ;;  %v62_v20 = vmul.f32 %v1634_v0, %v40_v17  ;;  %v42_v23 = vld [vmem:[#allocation3 + $0x48] sm:$0xff]  ;;  %v41_v24 = vld [vmem:[#allocation3 + $0x40] sm:$0xff]  ;;  %s1625_s1 = sshll.u32 %s1703_s0, 4  ;;  %s1626_s1 = int_to_ptr.vmem [resolvable:$true] %s1625_s1 }
  0x19   :  { %v78_v12 = vsel %vm71_vm0, %v57_v4, 0.0  ;;  %73 = vadd.xlane.f32.xlu0 %v72_v11  ;;  %v75_v13 = vsel %vm71_vm0, %v56_v7, 0.0  ;;  %v81_v14 = vsel %vm71_vm0, %v58_v8, 0.0  ;;  %v61_v22 = vmul.f32 %v1634_v0, %v39_v18  ;;  %v44_v29 = vld [vmem:[#allocation3 + $0x58] sm:$0xff]  ;;  %v43_v30 = vld [vmem:[#allocation3 + $0x50] sm:$0xff]  ;;  %v46_v35 = vld [vmem:[#allocation3 + $0x68] sm:$0xff]  ;;  %p1676_p9 = scmp.lt.s32.totalorder %s1626_s1, %s1626_s1 }
  0x1a   :  { %79 = vadd.xlane.f32.xlu1 %v78_v12  ;;  %v87_v19 = vsel %vm71_vm0, %v60_v15, 0.0  ;;  %v84_v21 = vsel %vm71_vm0, %v59_v16, 0.0  ;;  %v93_v25 = vsel %vm71_vm0, %v62_v20, 0.0  ;;  %v64_v26 = vmul.f32 %v1634_v0, %v42_v23  ;;  %v45_v36 = vld [vmem:[#allocation3 + $0x60] sm:$0xff]  ;;  %v48_v39 = vld [vmem:[#allocation3 + $0x78] sm:$0xff]  ;;  %v47_v42 = vld [vmem:[#allocation3 + $0x70] sm:$0xff] }
  0x1b   :  { %v90_v27 = vsel %vm71_vm0, %v61_v22, 0.0  ;;  %v63_v28 = vmul.f32 %v1634_v0, %v41_v24  ;;  %v66_v32 = vmul.f32 %v1634_v0, %v44_v29  ;;  %v65_v34 = vmul.f32 %v1634_v0, %v43_v30  ;;  %s1671_s26 = scalar_lea.vmem %s1626_s1, 16  ;;  %s1675_s27 = scalar_lea.vmem %s1626_s1, 32 }
  0x1c   :  { %v99_v31 = vsel %vm71_vm0, %v64_v26, 0.0  ;;  %v68_v38 = vmul.f32 %v1634_v0, %v46_v35  ;;  %v67_v41 = vmul.f32 %v1634_v0, %v45_v36  ;;  %v70_v43 = vmul.f32 %v1634_v0, %v48_v39  ;;  %p1672_p8 = scmp.ne.s32.totalorder %s1626_s1, %s1671_s26  ;;  %p1677_p10 = scmp.lt.s32.totalorder %s1675_s27, %s1671_s26 }
  0x1d   :  { %76 = vadd.xlane.f32.xlu0 %v75_v13  ;;  %v96_v33 = vsel %vm71_vm0, %v63_v28, 0.0  ;;  %v105_v37 = vsel %vm71_vm0, %v66_v32, 0.0  ;;  %v102_v40 = vsel %vm71_vm0, %v65_v34, 0.0  ;;  %v69_v46 = vmul.f32 %v1634_v0, %v47_v42 }
  0x1e   :  { %82 = vadd.xlane.f32.xlu1 %v81_v14  ;;  %v111_v44 = vsel %vm71_vm0, %v68_v38, 0.0  ;;  %v108_v45 = vsel %vm71_vm0, %v67_v41, 0.0  ;;  %v117_v48 = vsel %vm71_vm0, %v70_v43, 0.0  ;;  %v1751_v53 = vshrl.u32 %v136_v50, 7  ;;  %p1678_p11 = por %p1677_p10, %p1676_p9 }
  0x1f   :  { %v114_v49 = vsel %vm71_vm0, %v69_v46, 0.0  ;;  %v654_v54 = vunpack.c.0.s8 %v653_v52  ;;  %vm1491_vm1 = vcmask 130112   ;;  %vm1498_vm2 = vcmask 195712  }
  0x20   :  { %v1754_v55 = vsub.s32 0, %v1751_v53  ;;  %v1757_v56 = vsub.s32 1, %v1751_v53  ;;  %v1760_v57 = vsub.s32 2, %v1751_v53  ;;  %v1763_v58 = vsub.s32 3, %v1751_v53  ;;  %p1679_p12 = pnand %p1678_p11, %p1672_p8 }
  0x21   :  { %85 = vadd.xlane.f32.xlu0 %v84_v21  ;;  %v1766_v59 = vsub.s32 4, %v1751_v53  ;;  %v1769_v60 = vsub.s32 5, %v1751_v53  ;;  %v1772_v61 = vsub.s32 6, %v1751_v53  ;;  %v1775_v62 = vsub.s32 7, %v1751_v53 }
  0x22   :  { %88 = vadd.xlane.f32.xlu1 %v87_v19  ;;  %v1778_v1 = vsub.s32 %v654_v54, %v1751_v53  ;;  %vm1505_vm3 = vcmask 261312   ;;  %vm1512_vm4 = vcmask 326912   ;;  %vm1519_vm5 = vcmask 392512  }
  0x23   :  { %vm1526_vm6 = vcmask 458112   ;;  %vm1533_vm7 = vcmask 523712   ;;  %vm1540_vm8 = vcmask 589312   ;;  %vm1547_vm9 = vcmask 654912  }
  0x24   :  { %vm1554_vm10 = vcmask 720512   ;;  %vm1561_vm11 = vcmask 786112   ;;  %vm1568_vm12 = vcmask 851712   ;;  %vm1575_vm13 = vcmask 917312  }
  0x25   :  { %91 = vadd.xlane.f32.xlu0 %v90_v27  ;;  %vm1582_vm14 = vcmask 982912   ;;  %vm1589_vm15 = vcmask 1048512  }
  0x26   :  { %94 = vadd.xlane.f32.xlu1 %v93_v25 }
  0x29   :  { %97 = vadd.xlane.f32.xlu0 %v96_v33 }
  0x2a   :  { %100 = vadd.xlane.f32.xlu1 %v99_v31 }
  0x2d   :  { %103 = vadd.xlane.f32.xlu0 %v102_v40 }
  0x2e   :  { %106 = vadd.xlane.f32.xlu1 %v105_v37 }
  0x31   :  { %109 = vadd.xlane.f32.xlu0 %v108_v45 }
  0x32   :  { %112 = vadd.xlane.f32.xlu1 %v111_v44 }
  0x35   :  { %115 = vadd.xlane.f32.xlu0 %v114_v49 }
  0x36   :  { %118 = vadd.xlane.f32.xlu1 %v117_v48 }
  0xa6   :  { %v74_v63 = vpop.xlane.xlu0 %73 }
  0xa7   :  { %v80_v0 = vpop.xlane.xlu1 %79  ;;  %v139_v2 = vrot.slane %v74_v63, %v1754_v55  ;;  %v143_v3 = vrot.slane %v74_v63, %v1757_v56  ;;  %v147_v4 = vrot.slane %v74_v63, %v1760_v57  ;;  %v151_v5 = vrot.slane %v74_v63, %v1763_v58 }
  0xa8   :  { %v155_v6 = vrot.slane %v74_v63, %v1766_v59  ;;  %v159_v7 = vrot.slane %v74_v63, %v1769_v60  ;;  %v163_v8 = vrot.slane %v74_v63, %v1772_v61  ;;  %v167_v9 = vrot.slane %v74_v63, %v1775_v62 }
  0xa9   :  { %v648_v10 = vcombine.low %v139_v2, %v143_v3  ;;  %v649_v11 = vcombine.low %v147_v4, %v151_v5  ;;  %v203_v12 = vrot.slane %v80_v0, %v1754_v55  ;;  %v207_v13 = vrot.slane %v80_v0, %v1757_v56 }
  0xaa   :  { %v77_v14 = vpop.xlane.xlu0 %76  ;;  %v650_v16 = vcombine.low %v155_v6, %v159_v7  ;;  %v651_v17 = vcombine.low %v163_v8, %v167_v9  ;;  %v211_v18 = vrot.slane %v80_v0, %v1760_v57  ;;  %v215_v19 = vrot.slane %v80_v0, %v1763_v58 }
  0xab   :  { %v1790_v15 = vpop.xlane.xlu1 %82  ;;  %v658_v20 = vrot.slane %v648_v10, %v1778_v1  ;;  %v665_v21 = vrot.slane %v649_v11, %v1778_v1  ;;  %v171_v22 = vrot.slane %v77_v14, %v1754_v55  ;;  %v175_v23 = vrot.slane %v77_v14, %v1757_v56 }
  0xac   :  { %v672_v24 = vrot.slane %v650_v16, %v1778_v1  ;;  %v679_v25 = vrot.slane %v651_v17, %v1778_v1  ;;  %v179_v26 = vrot.slane %v77_v14, %v1760_v57  ;;  %v183_v27 = vrot.slane %v77_v14, %v1763_v58 }
  0xad   :  { %v680_v28 = vcombine.low %v658_v20, %v665_v21  ;;  %v187_v29 = vrot.slane %v77_v14, %v1766_v59  ;;  %v191_v30 = vrot.slane %v77_v14, %v1769_v60  ;;  %v195_v31 = vrot.slane %v77_v14, %v1772_v61 }
  0xae   :  { %v681_v33 = vcombine.low %v672_v24, %v679_v25  ;;  %v199_v34 = vrot.slane %v77_v14, %v1775_v62  ;;  %v697_v35 = vcombine.low %v171_v22, %v175_v23  ;;  %v698_v36 = vcombine.low %v179_v26, %v183_v27 }
  0xaf   :  { %v1805_v32 = vpop.xlane.xlu1 %88  ;;  %v688_v37 = vrot.slane %v680_v28, %v1778_v1  ;;  %v699_v38 = vcombine.low %v187_v29, %v191_v30  ;;  %v219_v39 = vrot.slane %v80_v0, %v1766_v59  ;;  %v223_v40 = vrot.slane %v80_v0, %v1769_v60 }
  0xb0   :  { %v695_v41 = vrot.slane %v681_v33, %v1778_v1  ;;  %v700_v42 = vcombine.low %v195_v31, %v199_v34  ;;  %v707_v43 = vrot.slane %v697_v35, %v1778_v1  ;;  %v714_v44 = vrot.slane %v698_v36, %v1778_v1 }
  0xb1   :  { %v721_v45 = vrot.slane %v699_v38, %v1778_v1  ;;  %v227_v46 = vrot.slane %v80_v0, %v1772_v61  ;;  %v231_v47 = vrot.slane %v80_v0, %v1775_v62  ;;  %v746_v48 = vcombine.low %v203_v12, %v207_v13  ;;  %v86_v13 = vpop.xlane.xlu0 %85 }
  0xb2   :  { %v696_v49 = vcombine.low %v688_v37, %v695_v41  ;;  %v728_v51 = vrot.slane %v700_v42, %v1778_v1  ;;  %v729_v52 = vcombine.low %v707_v43, %v714_v44  ;;  %v747_v54 = vcombine.low %v211_v18, %v215_v19 }
  0xb3   :  { %v748_v63 = vcombine.low %v219_v39, %v223_v40  ;;  %v749_v2 = vcombine.low %v227_v46, %v231_v47  ;;  %v756_v3 = vrot.slane %v746_v48, %v1778_v1  ;;  %v235_v4 = vrot.slane %v1790_v15, %v1754_v55  ;;  %v1821_v5 = vpop.xlane.xlu1 %94 }
  0xb4   :  { %1433 = vperm.xlu0 %1643, %v696_v49   ;;  %v730_v6 = vcombine.low %v721_v45, %v728_v51  ;;  %v737_v7 = vrot.slane %v729_v52, %v1778_v1  ;;  %v763_v0 = vrot.slane %v747_v54, %v1778_v1  ;;  %v239_v8 = vrot.slane %v1790_v15, %v1757_v56 }
  0xb5   :  { %v770_v9 = vrot.slane %v748_v63, %v1778_v1  ;;  %v777_v10 = vrot.slane %v749_v2, %v1778_v1  ;;  %v243_v11 = vrot.slane %v1790_v15, %v1760_v57  ;;  %v247_v12 = vrot.slane %v1790_v15, %v1763_v58 }
  0xb6   :  { %v744_v14 = vrot.slane %v730_v6, %v1778_v1  ;;  %v778_v16 = vcombine.low %v756_v3, %v763_v0  ;;  %v251_v17 = vrot.slane %v1790_v15, %v1766_v59  ;;  %v255_v18 = vrot.slane %v1790_v15, %v1769_v60 }
  0xb7   :  { %v779_v19 = vcombine.low %v770_v9, %v777_v10  ;;  %v259_v20 = vrot.slane %v1790_v15, %v1772_v61  ;;  %v263_v21 = vrot.slane %v1790_v15, %v1775_v62  ;;  %v795_v22 = vcombine.low %v235_v4, %v239_v8  ;;  %v101_v31 = vpop.xlane.xlu1 %100 }
  0xb8   :  { %v745_v23 = vcombine.low %v737_v7, %v744_v14  ;;  %v786_v24 = vrot.slane %v778_v16, %v1778_v1  ;;  %v796_v25 = vcombine.low %v243_v11, %v247_v12  ;;  %v797_v26 = vcombine.low %v251_v17, %v255_v18 }
  0xb9   :  { %v793_v27 = vrot.slane %v779_v19, %v1778_v1  ;;  %v798_v28 = vcombine.low %v259_v20, %v263_v21  ;;  %v805_v29 = vrot.slane %v795_v22, %v1778_v1  ;;  %v267_v30 = vrot.slane %v86_v13, %v1754_v55 }
  0xba   :  { %1436 = vperm.xlu1 %1644, %v745_v23   ;;  %v812_v33 = vrot.slane %v796_v25, %v1778_v1  ;;  %v819_v34 = vrot.slane %v797_v26, %v1778_v1  ;;  %v271_v15 = vrot.slane %v86_v13, %v1757_v56  ;;  %v275_v35 = vrot.slane %v86_v13, %v1760_v57 }
  0xbb   :  { %v794_v36 = vcombine.low %v786_v24, %v793_v27  ;;  %v826_v37 = vrot.slane %v798_v28, %v1778_v1  ;;  %v279_v38 = vrot.slane %v86_v13, %v1763_v58  ;;  %v283_v39 = vrot.slane %v86_v13, %v1766_v59  ;;  %v107_v25 = vpop.xlane.xlu1 %106 }
  0xbc   :  { %v827_v40 = vcombine.low %v805_v29, %v812_v33  ;;  %v287_v41 = vrot.slane %v86_v13, %v1769_v60  ;;  %v291_v42 = vrot.slane %v86_v13, %v1772_v61  ;;  %v295_v43 = vrot.slane %v86_v13, %v1775_v62 }
  0xbd   :  { %v828_v44 = vcombine.low %v819_v34, %v826_v37  ;;  %v844_v45 = vcombine.low %v267_v30, %v271_v15  ;;  %v845_v46 = vcombine.low %v275_v35, %v279_v38  ;;  %v427_v47 = vrot.slane %v101_v31, %v1754_v55 }
  0xbe   :  { %1439 = vperm.xlu1 %1644, %v794_v36   ;;  %v835_v48 = vrot.slane %v827_v40, %v1778_v1  ;;  %v846_v49 = vcombine.low %v283_v39, %v287_v41  ;;  %v847_v51 = vcombine.low %v291_v42, %v295_v43  ;;  %v431_v52 = vrot.slane %v101_v31, %v1757_v56 }
  0xbf   :  { %v842_v54 = vrot.slane %v828_v44, %v1778_v1  ;;  %v854_v63 = vrot.slane %v844_v45, %v1778_v1  ;;  %v861_v2 = vrot.slane %v845_v46, %v1778_v1  ;;  %v435_v3 = vrot.slane %v101_v31, %v1760_v57 }
  0xc0   :  { %v868_v4 = vrot.slane %v846_v49, %v1778_v1  ;;  %v875_v6 = vrot.slane %v847_v51, %v1778_v1  ;;  %v439_v7 = vrot.slane %v101_v31, %v1763_v58  ;;  %v443_v0 = vrot.slane %v101_v31, %v1766_v59  ;;  %v92_v49 = vpop.xlane.xlu0 %91 }
  0xc1   :  { %v843_v8 = vcombine.low %v835_v48, %v842_v54  ;;  %v876_v9 = vcombine.low %v854_v63, %v861_v2  ;;  %v447_v10 = vrot.slane %v101_v31, %v1769_v60  ;;  %v451_v11 = vrot.slane %v101_v31, %v1772_v61 }
  0xc2   :  { %v877_v12 = vcombine.low %v868_v4, %v875_v6  ;;  %v455_v13 = vrot.slane %v101_v31, %v1775_v62  ;;  %v1089_v14 = vcombine.low %v427_v47, %v431_v52  ;;  %v1090_v16 = vcombine.low %v435_v3, %v439_v7 }
  0xc3   :  { %1442 = vperm.xlu1 %1644, %v843_v8   ;;  %v884_v17 = vrot.slane %v876_v9, %v1778_v1  ;;  %v1091_v18 = vcombine.low %v443_v0, %v447_v10  ;;  %v299_v19 = vrot.slane %v1805_v32, %v1754_v55  ;;  %v303_v20 = vrot.slane %v1805_v32, %v1757_v56 }
  0xc4   :  { %v891_v21 = vrot.slane %v877_v12, %v1778_v1  ;;  %v1092_v22 = vcombine.low %v451_v11, %v455_v13  ;;  %v1099_v23 = vrot.slane %v1089_v14, %v1778_v1  ;;  %v1106_v24 = vrot.slane %v1090_v16, %v1778_v1 }
  0xc5   :  { %v1113_v26 = vrot.slane %v1091_v18, %v1778_v1  ;;  %v307_v27 = vrot.slane %v1805_v32, %v1760_v57  ;;  %v311_v28 = vrot.slane %v1805_v32, %v1763_v58  ;;  %v315_v29 = vrot.slane %v1805_v32, %v1766_v59 }
  0xc6   :  { %v892_v30 = vcombine.low %v884_v17, %v891_v21  ;;  %v1120_v31 = vrot.slane %v1092_v22, %v1778_v1  ;;  %v1121_v33 = vcombine.low %v1099_v23, %v1106_v24  ;;  %v319_v34 = vrot.slane %v1805_v32, %v1769_v60 }
  0xc7   :  { %v323_v15 = vrot.slane %v1805_v32, %v1772_v61  ;;  %v327_v35 = vrot.slane %v1805_v32, %v1775_v62  ;;  %v893_v36 = vcombine.low %v299_v19, %v303_v20  ;;  %v894_v37 = vcombine.low %v307_v27, %v311_v28  ;;  %v113_v19 = vpop.xlane.xlu1 %112 }
  0xc8   :  { %1445 = vperm.xlu1 %1644, %v892_v30   ;;  %v1122_v38 = vcombine.low %v1113_v26, %v1120_v31  ;;  %v1129_v39 = vrot.slane %v1121_v33, %v1778_v1  ;;  %v895_v40 = vcombine.low %v315_v29, %v319_v34  ;;  %v491_v41 = vrot.slane %v107_v25, %v1754_v55 }
  0xc9   :  { %v896_v42 = vcombine.low %v323_v15, %v327_v35  ;;  %v903_v43 = vrot.slane %v893_v36, %v1778_v1  ;;  %v910_v44 = vrot.slane %v894_v37, %v1778_v1  ;;  %v495_v45 = vrot.slane %v107_v25, %v1757_v56 }
  0xca   :  { %v1136_v46 = vrot.slane %v1122_v38, %v1778_v1  ;;  %v917_v32 = vrot.slane %v895_v40, %v1778_v1  ;;  %v499_v47 = vrot.slane %v107_v25, %v1760_v57  ;;  %v503_v48 = vrot.slane %v107_v25, %v1763_v58 }
  0xcb   :  { %v924_v51 = vrot.slane %v896_v42, %v1778_v1  ;;  %v925_v52 = vcombine.low %v903_v43, %v910_v44  ;;  %v507_v54 = vrot.slane %v107_v25, %v1766_v59  ;;  %v511_v63 = vrot.slane %v107_v25, %v1769_v60 }
  0xcc   :  { %v1137_v2 = vcombine.low %v1129_v39, %v1136_v46  ;;  %v515_v3 = vrot.slane %v107_v25, %v1772_v61  ;;  %v519_v4 = vrot.slane %v107_v25, %v1775_v62  ;;  %v1187_v6 = vcombine.low %v491_v41, %v495_v45 }
  0xcd   :  { %v926_v7 = vcombine.low %v917_v32, %v924_v51  ;;  %v933_v0 = vrot.slane %v925_v52, %v1778_v1  ;;  %v1188_v8 = vcombine.low %v499_v47, %v503_v48  ;;  %v1189_v9 = vcombine.low %v507_v54, %v511_v63 }
  0xce   :  { %1460 = vperm.xlu0 %1643, %v1137_v2   ;;  %v1190_v10 = vcombine.low %v515_v3, %v519_v4  ;;  %v1197_v11 = vrot.slane %v1187_v6, %v1778_v1  ;;  %v331_v12 = vrot.slane %v92_v49, %v1754_v55  ;;  %v335_v13 = vrot.slane %v92_v49, %v1757_v56 }
  0xcf   :  { %v940_v14 = vrot.slane %v926_v7, %v1778_v1  ;;  %v1204_v16 = vrot.slane %v1188_v8, %v1778_v1  ;;  %v1211_v17 = vrot.slane %v1189_v9, %v1778_v1  ;;  %v339_v18 = vrot.slane %v92_v49, %v1760_v57 }
  0xd0   :  { %v1218_v20 = vrot.slane %v1190_v10, %v1778_v1  ;;  %v343_v21 = vrot.slane %v92_v49, %v1763_v58  ;;  %v347_v22 = vrot.slane %v92_v49, %v1766_v59  ;;  %v351_v23 = vrot.slane %v92_v49, %v1769_v60 }
  0xd1   :  { %v941_v24 = vcombine.low %v933_v0, %v940_v14  ;;  %v1219_v25 = vcombine.low %v1197_v11, %v1204_v16  ;;  %v355_v26 = vrot.slane %v92_v49, %v1772_v61  ;;  %v359_v27 = vrot.slane %v92_v49, %v1775_v62  ;;  %v119_v0 = vpop.xlane.xlu1 %118 }
  0xd2   :  { %v1220_v28 = vcombine.low %v1211_v17, %v1218_v20  ;;  %v942_v29 = vcombine.low %v331_v12, %v335_v13  ;;  %v943_v30 = vcombine.low %v339_v18, %v343_v21  ;;  %v944_v31 = vcombine.low %v347_v22, %v351_v23  ;;  %v98_v21 = vpop.xlane.xlu0 %97 }
  0xd3   :  { %1448 = vperm.xlu1 %1644, %v941_v24   ;;  %v1227_v33 = vrot.slane %v1219_v25, %v1778_v1  ;;  %v945_v34 = vcombine.low %v355_v26, %v359_v27  ;;  %v555_v15 = vrot.slane %v113_v19, %v1754_v55  ;;  %v559_v35 = vrot.slane %v113_v19, %v1757_v56 }
  0xd4   :  { %v1234_v36 = vrot.slane %v1220_v28, %v1778_v1  ;;  %v952_v37 = vrot.slane %v942_v29, %v1778_v1  ;;  %v959_v38 = vrot.slane %v943_v30, %v1778_v1  ;;  %v966_v39 = vrot.slane %v944_v31, %v1778_v1 }
  0xd5   :  { %v973_v40 = vrot.slane %v945_v34, %v1778_v1  ;;  %v563_v41 = vrot.slane %v113_v19, %v1760_v57  ;;  %v567_v42 = vrot.slane %v113_v19, %v1763_v58  ;;  %v571_v43 = vrot.slane %v113_v19, %v1766_v59 }
  0xd6   :  { %v1235_v44 = vcombine.low %v1227_v33, %v1234_v36  ;;  %v974_v45 = vcombine.low %v952_v37, %v959_v38  ;;  %v575_v46 = vrot.slane %v113_v19, %v1769_v60  ;;  %v579_v32 = vrot.slane %v113_v19, %v1772_v61 }
  0xd7   :  { %v975_v47 = vcombine.low %v966_v39, %v973_v40  ;;  %v583_v48 = vrot.slane %v113_v19, %v1775_v62  ;;  %v1285_v49 = vcombine.low %v555_v15, %v559_v35  ;;  %v1286_v51 = vcombine.low %v563_v41, %v567_v42 }
  0xd8   :  { %1466 = vperm.xlu0 %1643, %v1235_v44   ;;  %v982_v52 = vrot.slane %v974_v45, %v1778_v1  ;;  %v1287_v54 = vcombine.low %v571_v43, %v575_v46  ;;  %v363_v63 = vrot.slane %v1821_v5, %v1754_v55  ;;  %v367_v2 = vrot.slane %v1821_v5, %v1757_v56  ;;  %v104_v45 = vpop.xlane.xlu0 %103 }
  0xd9   :  { %v989_v3 = vrot.slane %v975_v47, %v1778_v1  ;;  %v1288_v4 = vcombine.low %v579_v32, %v583_v48  ;;  %v1295_v6 = vrot.slane %v1285_v49, %v1778_v1  ;;  %v1302_v7 = vrot.slane %v1286_v51, %v1778_v1 }
  0xda   :  { %v1309_v8 = vrot.slane %v1287_v54, %v1778_v1  ;;  %v371_v9 = vrot.slane %v1821_v5, %v1760_v57  ;;  %v375_v10 = vrot.slane %v1821_v5, %v1763_v58  ;;  %v379_v11 = vrot.slane %v1821_v5, %v1766_v59 }
  0xdb   :  { %v990_v12 = vcombine.low %v982_v52, %v989_v3  ;;  %v1316_v13 = vrot.slane %v1288_v4, %v1778_v1  ;;  %v1317_v14 = vcombine.low %v1295_v6, %v1302_v7  ;;  %v383_v16 = vrot.slane %v1821_v5, %v1769_v60 }
  0xdc   :  { %v387_v17 = vrot.slane %v1821_v5, %v1772_v61  ;;  %v391_v18 = vrot.slane %v1821_v5, %v1775_v62  ;;  %v991_v19 = vcombine.low %v363_v63, %v367_v2  ;;  %v992_v20 = vcombine.low %v371_v9, %v375_v10 }
  0xdd   :  { %1451 = vperm.xlu1 %1644, %v990_v12   ;;  %v1318_v22 = vcombine.low %v1309_v8, %v1316_v13  ;;  %v1325_v23 = vrot.slane %v1317_v14, %v1778_v1  ;;  %v993_v24 = vcombine.low %v379_v11, %v383_v16  ;;  %v619_v25 = vrot.slane %v119_v0, %v1754_v55 }
  0xde   :  { %v994_v26 = vcombine.low %v387_v17, %v391_v18  ;;  %v1001_v27 = vrot.slane %v991_v19, %v1778_v1  ;;  %v1008_v28 = vrot.slane %v992_v20, %v1778_v1  ;;  %v623_v29 = vrot.slane %v119_v0, %v1757_v56  ;;  %v110_v18 = vpop.xlane.xlu0 %109 }
  0xdf   :  { %v1332_v30 = vrot.slane %v1318_v22, %v1778_v1  ;;  %v1015_v5 = vrot.slane %v993_v24, %v1778_v1  ;;  %v627_v31 = vrot.slane %v119_v0, %v1760_v57  ;;  %v631_v33 = vrot.slane %v119_v0, %v1763_v58 }
  0xe0   :  { %v1022_v34 = vrot.slane %v994_v26, %v1778_v1  ;;  %v1023_v15 = vcombine.low %v1001_v27, %v1008_v28  ;;  %v635_v35 = vrot.slane %v119_v0, %v1766_v59  ;;  %v639_v36 = vrot.slane %v119_v0, %v1769_v60 }
  0xe1   :  { %v1333_v37 = vcombine.low %v1325_v23, %v1332_v30  ;;  %v643_v38 = vrot.slane %v119_v0, %v1772_v61  ;;  %v647_v39 = vrot.slane %v119_v0, %v1775_v62  ;;  %v1383_v40 = vcombine.low %v619_v25, %v623_v29 }
  0xe2   :  { %v1024_v41 = vcombine.low %v1015_v5, %v1022_v34  ;;  %v1031_v42 = vrot.slane %v1023_v15, %v1778_v1  ;;  %v1384_v43 = vcombine.low %v627_v31, %v631_v33  ;;  %v1385_v44 = vcombine.low %v635_v35, %v639_v36 }
  0xe3   :  { %1472 = vperm.xlu0 %1643, %v1333_v37   ;;  %v1386_v46 = vcombine.low %v643_v38, %v647_v39  ;;  %v1393_v32 = vrot.slane %v1383_v40, %v1778_v1  ;;  %v395_v47 = vrot.slane %v98_v21, %v1754_v55  ;;  %v399_v48 = vrot.slane %v98_v21, %v1757_v56 }
  0xe4   :  { %v1038_v49 = vrot.slane %v1024_v41, %v1778_v1  ;;  %v1400_v51 = vrot.slane %v1384_v43, %v1778_v1  ;;  %v1407_v52 = vrot.slane %v1385_v44, %v1778_v1  ;;  %v403_v54 = vrot.slane %v98_v21, %v1760_v57 }
  0xe5   :  { %v1414_v63 = vrot.slane %v1386_v46, %v1778_v1  ;;  %v407_v2 = vrot.slane %v98_v21, %v1763_v58  ;;  %v411_v3 = vrot.slane %v98_v21, %v1766_v59  ;;  %v415_v4 = vrot.slane %v98_v21, %v1769_v60 }
  0xe6   :  { %v1039_v6 = vcombine.low %v1031_v42, %v1038_v49  ;;  %v1415_v7 = vcombine.low %v1393_v32, %v1400_v51  ;;  %v419_v0 = vrot.slane %v98_v21, %v1772_v61  ;;  %v423_v8 = vrot.slane %v98_v21, %v1775_v62  ;;  %v116_v42 = vpop.xlane.xlu0 %115 }
  0xe7   :  { %v1416_v9 = vcombine.low %v1407_v52, %v1414_v63  ;;  %v1040_v10 = vcombine.low %v395_v47, %v399_v48  ;;  %v1041_v11 = vcombine.low %v403_v54, %v407_v2  ;;  %v1042_v12 = vcombine.low %v411_v3, %v415_v4 }
  0xe8   :  { %1454 = vperm.xlu1 %1644, %v1039_v6   ;;  %v1423_v13 = vrot.slane %v1415_v7, %v1778_v1  ;;  %v1043_v14 = vcombine.low %v419_v0, %v423_v8  ;;  %v459_v16 = vrot.slane %v104_v45, %v1754_v55  ;;  %v463_v17 = vrot.slane %v104_v45, %v1757_v56 }
  0xe9   :  { %v1430_v19 = vrot.slane %v1416_v9, %v1778_v1  ;;  %v1050_v20 = vrot.slane %v1040_v10, %v1778_v1  ;;  %v1057_v22 = vrot.slane %v1041_v11, %v1778_v1  ;;  %v1064_v21 = vrot.slane %v1042_v12, %v1778_v1 }
  0xea   :  { %v1071_v23 = vrot.slane %v1043_v14, %v1778_v1  ;;  %v467_v24 = vrot.slane %v104_v45, %v1760_v57  ;;  %v471_v25 = vrot.slane %v104_v45, %v1763_v58  ;;  %v475_v26 = vrot.slane %v104_v45, %v1766_v59 }
  0xeb   :  { %v1431_v27 = vcombine.low %v1423_v13, %v1430_v19  ;;  %v1072_v28 = vcombine.low %v1050_v20, %v1057_v22  ;;  %v479_v29 = vrot.slane %v104_v45, %v1769_v60  ;;  %v483_v30 = vrot.slane %v104_v45, %v1772_v61 }
  0xec   :  { %v1073_v5 = vcombine.low %v1064_v21, %v1071_v23  ;;  %v487_v31 = vrot.slane %v104_v45, %v1775_v62  ;;  %v1138_v33 = vcombine.low %v459_v16, %v463_v17  ;;  %v1139_v34 = vcombine.low %v467_v24, %v471_v25 }
  0xed   :  { %1478 = vperm.xlu0 %1643, %v1431_v27   ;;  %v1080_v15 = vrot.slane %v1072_v28, %v1778_v1  ;;  %v1140_v35 = vcombine.low %v475_v26, %v479_v29  ;;  %v523_v36 = vrot.slane %v110_v18, %v1754_v55  ;;  %v527_v37 = vrot.slane %v110_v18, %v1757_v56 }
  0xee   :  { %v1087_v38 = vrot.slane %v1073_v5, %v1778_v1  ;;  %v1141_v39 = vcombine.low %v483_v30, %v487_v31  ;;  %v1148_v40 = vrot.slane %v1138_v33, %v1778_v1  ;;  %v1155_v41 = vrot.slane %v1139_v34, %v1778_v1 }
  0xef   :  { %v1162_v43 = vrot.slane %v1140_v35, %v1778_v1  ;;  %v531_v44 = vrot.slane %v110_v18, %v1760_v57  ;;  %v535_v45 = vrot.slane %v110_v18, %v1763_v58  ;;  %v539_v46 = vrot.slane %v110_v18, %v1766_v59 }
  0xf0   :  { %v1088_v32 = vcombine.low %v1080_v15, %v1087_v38  ;;  %v1169_v47 = vrot.slane %v1141_v39, %v1778_v1  ;;  %v1170_v48 = vcombine.low %v1148_v40, %v1155_v41  ;;  %v543_v49 = vrot.slane %v110_v18, %v1769_v60 }
  0xf1   :  { %v547_v51 = vrot.slane %v110_v18, %v1772_v61  ;;  %v551_v52 = vrot.slane %v110_v18, %v1775_v62  ;;  %v1236_v54 = vcombine.low %v523_v36, %v527_v37  ;;  %v1237_v63 = vcombine.low %v531_v44, %v535_v45 }
  0xf2   :  { %1457 = vperm.xlu1 %1644, %v1088_v32   ;;  %v1171_v2 = vcombine.low %v1162_v43, %v1169_v47  ;;  %v1178_v3 = vrot.slane %v1170_v48, %v1778_v1  ;;  %v1238_v4 = vcombine.low %v539_v46, %v543_v49  ;;  %v587_v6 = vrot.slane %v116_v42, %v1754_v55 }
  0xf3   :  { %v1239_v7 = vcombine.low %v547_v51, %v551_v52  ;;  %v1246_v0 = vrot.slane %v1236_v54, %v1778_v1  ;;  %v1253_v8 = vrot.slane %v1237_v63, %v1778_v1  ;;  %v591_v9 = vrot.slane %v116_v42, %v1757_v56 }
  0xf4   :  { %v1185_v10 = vrot.slane %v1171_v2, %v1778_v1  ;;  %v1260_v11 = vrot.slane %v1238_v4, %v1778_v1  ;;  %v595_v12 = vrot.slane %v116_v42, %v1760_v57  ;;  %v599_v13 = vrot.slane %v116_v42, %v1763_v58 }
  0xf5   :  { %v1267_v14 = vrot.slane %v1239_v7, %v1778_v1  ;;  %v1268_v16 = vcombine.low %v1246_v0, %v1253_v8  ;;  %v603_v55 = vrot.slane %v116_v42, %v1766_v59  ;;  %v607_v17 = vrot.slane %v116_v42, %v1769_v60 }
  0xf6   :  { %v1186_v18 = vcombine.low %v1178_v3, %v1185_v10  ;;  %v611_v19 = vrot.slane %v116_v42, %v1772_v61  ;;  %v615_v56 = vrot.slane %v116_v42, %v1775_v62  ;;  %v1334_v20 = vcombine.low %v587_v6, %v591_v9 }
  0xf7   :  { %v1269_v22 = vcombine.low %v1260_v11, %v1267_v14  ;;  %v1276_v21 = vrot.slane %v1268_v16, %v1778_v1  ;;  %v1335_v23 = vcombine.low %v595_v12, %v599_v13  ;;  %v1336_v57 = vcombine.low %v603_v55, %v607_v17 }
  0xf8   :  { %1463 = vperm.xlu1 %1644, %v1186_v18   ;;  %v1337_v58 = vcombine.low %v611_v19, %v615_v56  ;;  %v1344_v24 = vrot.slane %v1334_v20, %v1778_v1  ;;  %v1702_v5 = vmov 0.0   ;;  %v2035_v36 = vand.u32 127, %v136_v50 }
  0xf9   :  { %v1283_v25 = vrot.slane %v1269_v22, %v1778_v1  ;;  %v1351_v59 = vrot.slane %v1335_v23, %v1778_v1  ;;  %v1358_v60 = vrot.slane %v1336_v57, %v1778_v1  ;;  %30 = vst [vmem:[#allocation2] sm:$0x1] %v1702_v5 }
  0xfa   :  { %v1365_v61 = vrot.slane %v1337_v58, %v1778_v1  ;;  %v1486_v37 = vadd.s32 4294967288, %v2035_v36  ;;  %v1493_v39 = vadd.s32 4294967280, %v2035_v36  ;;  %v1500_v40 = vadd.s32 4294967272, %v2035_v36 }
  0xfb   :  { %v1284_v26 = vcombine.low %v1276_v21, %v1283_v25  ;;  %v1366_v62 = vcombine.low %v1344_v24, %v1351_v59  ;;  %v1507_v41 = vadd.s32 4294967264, %v2035_v36  ;;  %v1514_v43 = vadd.s32 4294967256, %v2035_v36 }
  0xfc   :  { %v1367_v27 = vcombine.low %v1358_v60, %v1365_v61  ;;  %v1489_v42 = vsub.s32 %v1486_v37, %v1751_v53  ;;  %v1496_v45 = vsub.s32 %v1493_v39, %v1751_v53  ;;  %v1521_v46 = vadd.s32 4294967248, %v2035_v36 }
  0xfd   :  { %1469 = vperm.xlu1 %1644, %v1284_v26   ;;  %v1374_v28 = vrot.slane %v1366_v62, %v1778_v1  ;;  %v1484_v50 = vsub.s32 %v2035_v36, %v1751_v53  ;;  %v1503_v32 = vsub.s32 %v1500_v40, %v1751_v53  ;;  %v1528_v47 = vadd.s32 4294967240, %v2035_v36 }
  0xfe   :  { %v1381_v29 = vrot.slane %v1367_v27, %v1778_v1  ;;  %v1510_v49 = vsub.s32 %v1507_v41, %v1751_v53  ;;  %v1535_v51 = vadd.s32 4294967232, %v2035_v36  ;;  %v1517_v54 = vsub.s32 %v1514_v43, %v1751_v53 }
  0xff   :  { %v1524_v3 = vsub.s32 %v1521_v46, %v1751_v53  ;;  %v1531_v7 = vsub.s32 %v1528_v47, %v1751_v53  ;;  %v1549_v9 = vadd.s32 4294967216, %v2035_v36  ;;  %v1542_v11 = vadd.s32 4294967224, %v2035_v36 }
 0x100   :  { %v1382_v30 = vcombine.low %v1374_v28, %v1381_v29  ;;  %v1538_v8 = vsub.s32 %v1535_v51, %v1751_v53  ;;  %v1556_v17 = vadd.s32 4294967208, %v2035_v36  ;;  %v1563_v57 = vadd.s32 4294967200, %v2035_v36  ;;  %v32_v47 = vld [vmem:[#allocation2] sm:$0x1] }
 0x101   :  { %v1552_v22 = vsub.s32 %v1549_v9, %v1751_v53  ;;  %v1545_v21 = vsub.s32 %v1542_v11, %v1751_v53  ;;  %v1570_v59 = vadd.s32 4294967192, %v2035_v36  ;;  %v1577_v29 = vadd.s32 4294967184, %v2035_v36 }
 0x102   :  { %1475 = vperm.xlu1 %1644, %v1382_v30   ;;  %v1559_v62 = vsub.s32 %v1556_v17, %v1751_v53  ;;  %v1566_v27 = vsub.s32 %v1563_v57, %v1751_v53  ;;  %v1584_v30 = vadd.s32 4294967176, %v2035_v36 }
 0x103   :  { %v1580_v37 = vsub.s32 %v1577_v29, %v1751_v53 }
 0x133   :  { %v1434_v44 = vpop.permute.xlu0 %1433 }
 0x134   :  { %v1485_v4 = vrot.slane %v1434_v44, %v1484_v50 }
 0x139   :  { %v1437_v31 = vpop.permute.xlu1 %1436 }
 0x13a   :  { %v1490_v52 = vrot.slane %v1437_v31, %v1489_v42 }
 0x13c   :  { %v1492_v10 = vsel %vm1491_vm1, %v1490_v52, %v1485_v4 }
 0x13d   :  { %v1440_v33 = vpop.permute.xlu1 %1439 }
 0x13e   :  { %v1497_v63 = vrot.slane %v1440_v33, %v1496_v45 }
 0x140   :  { %v1499_v14 = vsel %vm1498_vm2, %v1497_v63, %v1492_v10 }
 0x142   :  { %v1443_v34 = vpop.permute.xlu1 %1442 }
 0x143   :  { %v1504_v6 = vrot.slane %v1443_v34, %v1503_v32 }
 0x145   :  { %v1506_v55 = vsel %vm1505_vm3, %v1504_v6, %v1499_v14 }
 0x147   :  { %v1446_v15 = vpop.permute.xlu1 %1445 }
 0x148   :  { %v1511_v0 = vrot.slane %v1446_v15, %v1510_v49  ;;  %v1573_v15 = vsub.s32 %v1570_v59, %v1751_v53 }
 0x14a   :  { %v1513_v19 = vsel %vm1512_vm4, %v1511_v0, %v1506_v55 }
 0x14d   :  { %v1461_v2 = vpop.permute.xlu0 %1460 }
 0x14e   :  { %v1546_v26 = vrot.slane %v1461_v2, %v1545_v21 }
 0x152   :  { %v1449_v35 = vpop.permute.xlu1 %1448 }
 0x153   :  { %v1518_v12 = vrot.slane %v1449_v35, %v1517_v54 }
 0x155   :  { %v1520_v23 = vsel %vm1519_vm5, %v1518_v12, %v1513_v19 }
 0x157   :  { %v1467_v56 = vpop.permute.xlu0 %1466 }
 0x158   :  { %v1560_v34 = vrot.slane %v1467_v56, %v1559_v62 }
 0x15c   :  { %v1452_v38 = vpop.permute.xlu1 %1451 }
 0x15d   :  { %v1525_v16 = vrot.slane %v1452_v38, %v1524_v3  ;;  %v1587_v38 = vsub.s32 %v1584_v30, %v1751_v53 }
 0x15f   :  { %v1527_v58 = vsel %vm1526_vm6, %v1525_v16, %v1520_v23 }
 0x162   :  { %v1473_v28 = vpop.permute.xlu0 %1472 }
 0x163   :  { %v1574_v42 = vrot.slane %v1473_v28, %v1573_v15 }
 0x167   :  { %v1455_v48 = vpop.permute.xlu1 %1454 }
 0x168   :  { %v1532_v18 = vrot.slane %v1455_v48, %v1531_v7 }
 0x16a   :  { %v1534_v24 = vsel %vm1533_vm7, %v1532_v18, %v1527_v58 }
 0x16c   :  { %v1479_v40 = vpop.permute.xlu0 %1478 }
 0x16d   :  { %v1588_v44 = vrot.slane %v1479_v40, %v1587_v38 }
 0x171   :  { %v1458_v13 = vpop.permute.xlu1 %1457 }
 0x172   :  { %v1539_v20 = vrot.slane %v1458_v13, %v1538_v8 }
 0x174   :  { %v1541_v60 = vsel %vm1540_vm8, %v1539_v20, %v1534_v24 }
 0x175   :  { %v1548_v5 = vsel %vm1547_vm9, %v1546_v26, %v1541_v60 }
 0x177   :  { %v1464_v25 = vpop.permute.xlu1 %1463 }
 0x178   :  { %v1553_v61 = vrot.slane %v1464_v25, %v1552_v22 }
 0x17a   :  { %v1555_v31 = vsel %vm1554_vm10, %v1553_v61, %v1548_v5 }
 0x17b   :  { %v1562_v39 = vsel %vm1561_vm11, %v1560_v34, %v1555_v31 }
 0x17c   :  { %v1470_v33 = vpop.permute.xlu1 %1469 }
 0x17d   :  { %v1567_v35 = vrot.slane %v1470_v33, %v1566_v27 }
 0x17f   :  { %v1569_v41 = vsel %vm1568_vm12, %v1567_v35, %v1562_v39 }
 0x180   :  { %v1576_v45 = vsel %vm1575_vm13, %v1574_v42, %v1569_v41 }
 0x181   :  { %v1476_v36 = vpop.permute.xlu1 %1475 }
 0x182   :  { %v1581_v43 = vrot.slane %v1476_v36, %v1580_v37 }
 0x184   :  { %v1583_v46 = vsel %vm1582_vm14, %v1581_v43, %v1576_v45 }
 0x185   :  { %v1590_v50 = vsel %vm1589_vm15, %v1588_v44, %v1583_v46 }
 0x186   :  { %v1597_v32 = vrot.slane %v1590_v50, %v1778_v1 }
 0x188   :  { %v1604_v48 = vrot.slane %v1597_v32, %v1778_v1 }
 0x18a   :  { %v1606_v49 = vadd.f32 %v1604_v48, %v32_v47 }
 0x18c   :  { %1607 = vst [vmem:[#allocation2] sm:$0x1] %v1606_v49 }
 0x193   :  { %v1611_v53 = vld [vmem:[#allocation2] sm:$0x1] }
 0x194   :  { %v1635_v51 = vmul.f32 -1.442695, %v1611_v53 }
 0x196   :  { %1645 = vpow2.f32 %v1635_v51 }
 0x1a0   :  { %v1646_v52 = vpop.eup %1645 }
 0x1a1   :  { %v1615_v54 = vadd.f32 1.0, %v1646_v52 }
 0x1a3   :  { %1647 = vrcp.f32 %v1615_v54 }
 0x1ad   :  { %v1648_v63 = vpop.eup %1647 }
 0x1ae   :  { %1618 = vst [vmem:[#allocation6] sm:$0x1] %v1648_v63 }
 0x1af   :  { %1682 = shalt.err (!%p1679_p12)
}
 0x1b0   :  { %s1683_s30 = scalar_lea.hbm %s2085_s2, 16 }
 0x1b1   :  { %p1684_p13 = scmp.ne.s32.totalorder %s2085_s2, %s1683_s30  ;;  %p1687_p0 = scmp.lt.u32.totalorder %s1683_s30, %s2085_s2 }
 0x1b3   :  { %p1689_p1 = pnand %p1687_p0, %p1684_p13 }
 0x1b5   :  { %1692 = shalt.err (!%p1689_p1)
}
 0x1b6   :  { %1628 = dma.vmem_to_hbm [thread:$0]  %s1626_s1, 16, %s2085_s2, [#allocation5]  }
 0x1b7   :  { %1695 = dma.done.wait [#allocation5], 16  }
 0x1b8   :  { %1696 = vsyncadd [#allocation5], 4294967280 }
 0x1b9   :  { %1632 = vsyncpa [#allocation4], 1 }
 0x1ba   :  { %1633 = vsyncpa [#allocation5], 1 }

</bundles_post_ra>
